<compile_context>
chip_gen: v5e
topology: v5e:2x2
jax: 0.10.0
libtpu: 0.0.40
codegen_flags: <defaults>
</compile_context>

<pallas_src>
import functools

import jax
import jax.numpy as jnp
from jax.experimental import pallas as pl
from jax.experimental.pallas import tpu as pltpu

LANE = 128      # lane width of a vreg (last-dim alignment target)
SUBLANE = 8     # sublane count of a vreg (second-to-last-dim alignment)
NEG_SLOPE = 0.01  # nn.LeakyReLU() default negative_slope


def _round_up(x, m):
    return (x + m - 1) // m * m


def _fused_mlp_kernel(x_ref, w_ref, b_ref, o_ref, *, num_layers):
    """Fused num_layers x (Linear [+ LeakyReLU except last]) in one kernel.

    x_ref: (B_pad, D_pad)     padded input activations (lane-dense)
    w_ref: (L, D_pad, D_pad)  stacked, pre-transposed, zero-padded weights
    b_ref: (L, 1, D_pad)      stacked, zero-padded biases
    o_ref: (B_pad, D_pad)     final activations (padded lanes are zero)
    """
    x = x_ref[...]
    # Static Python loop (L is small & fixed) -> fully unrolled, intermediates
    # stay in vregs; only the final layer's result is stored to HBM.
    for l in range(num_layers):
        y = jnp.dot(x, w_ref[l], preferred_element_type=jnp.float32)
        y = y + b_ref[l]                       # (1, D_pad) broadcasts over batch
        if l < num_layers - 1:
            y = jnp.where(y >= 0, y, NEG_SLOPE * y)
        x = y
    o_ref[...] = x.astype(o_ref.dtype)


def init_mlp_params(key, inp_dim, hidden_dim, num_layers):
    """Deterministic synthetic init mimicking nn.Linear shapes:
    W_l: (hidden_dim, in_dim), b_l: (hidden_dim,)."""
    params = []
    in_dim = inp_dim
    for _ in range(num_layers):
        key, kw, kb = jax.random.split(key, 3)
        bound = 1.0 / jnp.sqrt(jnp.float32(in_dim))
        w = jax.random.uniform(kw, (hidden_dim, in_dim), jnp.float32, -bound, bound)
        b = jax.random.uniform(kb, (hidden_dim,), jnp.float32, -bound, bound)
        params.append((w, b))
        in_dim = hidden_dim
    return params


def pack_params(params):
    """One-time preprocessing: transpose to (in, out), zero-pad both dims to a
    common lane-dense D_pad, and stack across layers.

    Returns (w_stacked: (L, D_pad, D_pad) f32, b_stacked: (L, 1, D_pad) f32).
    """
    dims = [max(w.shape) for w, _ in params]
    d_pad = _round_up(max(dims), LANE)
    ws, bs = [], []
    for w, b in params:
        out_f, in_f = w.shape
        w_t = jnp.transpose(w).astype(jnp.float32)          # (in, out)
        w_p = jnp.zeros((d_pad, d_pad), jnp.float32).at[:in_f, :out_f].set(w_t)
        b_p = jnp.zeros((1, d_pad), jnp.float32).at[0, :out_f].set(
            b.astype(jnp.float32))
        ws.append(w_p)
        bs.append(b_p)
    return jnp.stack(ws), jnp.stack(bs)


@functools.partial(jax.jit, static_argnames=("out_dim",))
def mlp_forward_packed(emb, w_stacked, b_stacked, *, out_dim):
    """Fused Pallas MLP forward on pre-packed params.

    emb: (B, inp_dim) f32.  Returns (B, out_dim) f32.
    """
    B, in_dim = emb.shape
    L, d_pad, _ = w_stacked.shape
    b_pad = _round_up(B, SUBLANE)

    # Zero-pad activations to (B_pad, D_pad): sublane/lane aligned, and the
    # zero lanes make the padded weight columns mathematically exact.
    x = jnp.zeros((b_pad, d_pad), jnp.float32).at[:B, :in_dim].set(emb)

    kernel = functools.partial(_fused_mlp_kernel, num_layers=L)
    out = pl.pallas_call(
        kernel,
        out_shape=jax.ShapeDtypeStruct((b_pad, d_pad), jnp.float32),
        in_specs=[
            pl.BlockSpec(memory_space=pltpu.MemorySpace.VMEM),  # x
            pl.BlockSpec(memory_space=pltpu.MemorySpace.VMEM),  # stacked W
            pl.BlockSpec(memory_space=pltpu.MemorySpace.VMEM),  # stacked b
        ],
        out_specs=pl.BlockSpec(memory_space=pltpu.MemorySpace.VMEM),
    )(x, w_stacked, b_stacked)

    return out[:B, :out_dim]


def mlp_forward(emb, params):
    """Convenience wrapper (packs params on the fly). For repeated calls,
    pack once with pack_params() and call mlp_forward_packed directly."""
    if len(params) == 0:
        return emb  # nn.Identity()
    out_dim = params[-1][0].shape[0]
    w_s, b_s = pack_params(params)
    return mlp_forward_packed(emb, w_s, b_s, out_dim=out_dim)


def mlp_reference(emb, params):
    """Plain-JAX reference for sanity checking."""
    x = emb
    n = len(params)
    for l, (w, b) in enumerate(params):
        x = x @ w.T + b
        if l < n - 1:
            x = jnp.where(x >= 0, x, NEG_SLOPE * x)
    return x


if __name__ == "__main__":
    key = jax.random.PRNGKey(0)
    k_in, k_par = jax.random.split(key)

    batch, inp_dim, hidden_dim, num_layers = 8, 16, 32, 3
    emb = jax.random.normal(k_in, (batch, inp_dim), jnp.float32)
    params = init_mlp_params(k_par, inp_dim, hidden_dim, num_layers)

    # One-time packing (pre-transposed, padded, stacked) — hoisted out of the
    # per-call path per the perf review.
    w_stacked, b_stacked = pack_params(params)

    out = mlp_forward_packed(emb, w_stacked, b_stacked, out_dim=hidden_dim)
    out = jax.block_until_ready(out)

    ref = mlp_reference(emb, params)
    assert out.shape == (batch, hidden_dim)
    assert jnp.allclose(out, ref, atol=1e-5, rtol=1e-5), "mismatch vs reference"

    print("KERNEL_OK")
</pallas_src>

<mosaic_0001>
module attributes {stable_mosaic.version = 11 : i64} {
  func.func @_fused_mlp_kernel(%arg0: memref<8x128xf32, #tpu.memory_space<vmem>>, %arg1: memref<3x128x128xf32, #tpu.memory_space<vmem>>, %arg2: memref<3x1x128xf32, #tpu.memory_space<vmem>>, %arg3: memref<8x128xf32, #tpu.memory_space<vmem>>) attributes {dimension_semantics = [], scalar_prefetch = 0 : i64, scratch_operands = 0 : i64, tpu.core_type = #tpu.core_type<tc>} {
    %c0 = arith.constant 0 : index
    %c0_0 = arith.constant 0 : index
    %0 = vector.load %arg0[%c0, %c0_0] : memref<8x128xf32, #tpu.memory_space<vmem>>, vector<8x128xf32>
    %c0_1 = arith.constant 0 : index
    %c0_2 = arith.constant 0 : index
    %c0_3 = arith.constant 0 : index
    %1 = vector.load %arg1[%c0_1, %c0_2, %c0_3] : memref<3x128x128xf32, #tpu.memory_space<vmem>>, vector<1x128x128xf32>
    %2 = vector.shape_cast %1 : vector<1x128x128xf32> to vector<128x128xf32>
    %cst = arith.constant dense<0.000000e+00> : vector<8x128xf32>
    %3 = tpu.matmul %0, %2, %cst {dimension_numbers = #tpu.dot_dimension_numbers<[1], [0], [0], [1], [0, 0, 1, 1], [], []>} : vector<8x128xf32>, vector<128x128xf32>, vector<8x128xf32> -> vector<8x128xf32>
    %c0_4 = arith.constant 0 : index
    %c0_5 = arith.constant 0 : index
    %c0_6 = arith.constant 0 : index
    %4 = vector.load %arg2[%c0_4, %c0_5, %c0_6] : memref<3x1x128xf32, #tpu.memory_space<vmem>>, vector<1x1x128xf32>
    %5 = vector.shape_cast %4 : vector<1x1x128xf32> to vector<1x128xf32>
    %6 = vector.broadcast %5 : vector<1x128xf32> to vector<8x128xf32>
    %7 = arith.addf %3, %6 : vector<8x128xf32>
    %cst_7 = arith.constant 0.000000e+00 : f32
    %8 = vector.broadcast %cst_7 : f32 to vector<8x128xf32>
    %9 = arith.cmpf oge, %7, %8 : vector<8x128xf32>
    %cst_8 = arith.constant 0.00999999977 : f32
    %10 = vector.broadcast %cst_8 : f32 to vector<8x128xf32>
    %11 = arith.mulf %10, %7 : vector<8x128xf32>
    %12 = arith.select %9, %7, %11 : vector<8x128xi1>, vector<8x128xf32>
    %c1 = arith.constant 1 : index
    %c0_9 = arith.constant 0 : index
    %c0_10 = arith.constant 0 : index
    %13 = vector.load %arg1[%c1, %c0_9, %c0_10] : memref<3x128x128xf32, #tpu.memory_space<vmem>>, vector<1x128x128xf32>
    %14 = vector.shape_cast %13 : vector<1x128x128xf32> to vector<128x128xf32>
    %cst_11 = arith.constant dense<0.000000e+00> : vector<8x128xf32>
    %15 = tpu.matmul %12, %14, %cst_11 {dimension_numbers = #tpu.dot_dimension_numbers<[1], [0], [0], [1], [0, 0, 1, 1], [], []>} : vector<8x128xf32>, vector<128x128xf32>, vector<8x128xf32> -> vector<8x128xf32>
    %c1_12 = arith.constant 1 : index
    %c0_13 = arith.constant 0 : index
    %c0_14 = arith.constant 0 : index
    %16 = vector.load %arg2[%c1_12, %c0_13, %c0_14] : memref<3x1x128xf32, #tpu.memory_space<vmem>>, vector<1x1x128xf32>
    %17 = vector.shape_cast %16 : vector<1x1x128xf32> to vector<1x128xf32>
    %18 = vector.broadcast %17 : vector<1x128xf32> to vector<8x128xf32>
    %19 = arith.addf %15, %18 : vector<8x128xf32>
    %cst_15 = arith.constant 0.000000e+00 : f32
    %20 = vector.broadcast %cst_15 : f32 to vector<8x128xf32>
    %21 = arith.cmpf oge, %19, %20 : vector<8x128xf32>
    %cst_16 = arith.constant 0.00999999977 : f32
    %22 = vector.broadcast %cst_16 : f32 to vector<8x128xf32>
    %23 = arith.mulf %22, %19 : vector<8x128xf32>
    %24 = arith.select %21, %19, %23 : vector<8x128xi1>, vector<8x128xf32>
    %c2 = arith.constant 2 : index
    %c0_17 = arith.constant 0 : index
    %c0_18 = arith.constant 0 : index
    %25 = vector.load %arg1[%c2, %c0_17, %c0_18] : memref<3x128x128xf32, #tpu.memory_space<vmem>>, vector<1x128x128xf32>
    %26 = vector.shape_cast %25 : vector<1x128x128xf32> to vector<128x128xf32>
    %cst_19 = arith.constant dense<0.000000e+00> : vector<8x128xf32>
    %27 = tpu.matmul %24, %26, %cst_19 {dimension_numbers = #tpu.dot_dimension_numbers<[1], [0], [0], [1], [0, 0, 1, 1], [], []>} : vector<8x128xf32>, vector<128x128xf32>, vector<8x128xf32> -> vector<8x128xf32>
    %c2_20 = arith.constant 2 : index
    %c0_21 = arith.constant 0 : index
    %c0_22 = arith.constant 0 : index
    %28 = vector.load %arg2[%c2_20, %c0_21, %c0_22] : memref<3x1x128xf32, #tpu.memory_space<vmem>>, vector<1x1x128xf32>
    %29 = vector.shape_cast %28 : vector<1x1x128xf32> to vector<1x128xf32>
    %30 = vector.broadcast %29 : vector<1x128xf32> to vector<8x128xf32>
    %31 = arith.addf %27, %30 : vector<8x128xf32>
    %c0_23 = arith.constant 0 : index
    %c0_24 = arith.constant 0 : index
    %32 = vector.load %arg3[%c0_23, %c0_24] : memref<8x128xf32, #tpu.memory_space<vmem>>, vector<8x128xf32>
    tpu.vector_store %arg3[%c0_23, %c0_24], %31 {strides = array<i32>} : memref<8x128xf32, #tpu.memory_space<vmem>>, vector<8x128xf32>,
    return
  }
}

</mosaic_0001>

<bundles_post_ra>
// kernel: mlp_forward_packed.1
= control target key start
LH: loop header
LB: loop body
LE: loop exit
PB: predicated region body
PF: predicated region fallthrough
CT: control target
= control target key end

     0   :  { %8 = vsyncpa [#allocation3], 0  ;;  %s283_s0 = inlined_call_operand.vmem [shape: f32[8,128], index: 0, kind: input, shape index: {}]   ;;  %s284_s1 = inlined_call_operand.hbm [shape: f32[3,128,128], index: 1, kind: input, shape index: {}]   ;;  %s285_s2 = inlined_call_operand.vmem [shape: f32[3,1,128], index: 2, kind: input, shape index: {}]   ;;  %s286_s3 = inlined_call_operand.hbm [shape: f32[8,128], index: 3, kind: output, shape index: {}]  }
   0x1   :  { %9 = vsyncpa [#allocation4], 0  ;;  %s16_s14 = sshll.u32 %s284_s1, 4  ;;  %s241_s15 = smov [#allocation2]   ;;  %s17_s14 = int_to_ptr.hbm [resolvable:$true] %s16_s14 }
   0x2   :  { %s18_s16 = sshll.u32 %s241_s15, 4  ;;  %s242_s17 = smov 128   ;;  %s19_s16 = int_to_ptr.vmem [resolvable:$true] %s18_s16 }
   0x3   :  { %s243_s18 = smov 8  }
   0x4   :  { %24 = dma.hbm_to_vmem [thread:$0]  %s17_s14, 6144, %s19_s16, [#allocation3], %s242_s17, %s242_s17, %s243_s18  }
   0x5   :  { %237 = dma.done.wait [#allocation3], 6144  }
   0x6   :  { %238 = vsyncadd [#allocation3], 4294961152  ;;  %v47_v0 = vld [vmem:[#allocation2 + $0x78] sm:$0xff]  ;;  %v46_v1 = vld [vmem:[#allocation2 + $0x70] sm:$0xff]  ;;  %s244_s25 = smov [#allocation5]   ;;  %s170_s29 = sshll.u32 %s286_s3, 4  ;;  %s171_s29 = int_to_ptr.hbm [resolvable:$true] %s170_s29 }
   0x7   :  { %52 = vmatpush.msra.mxu0 %v47_v0  ;;  %v45_v2 = vld [vmem:[#allocation2 + $0x68] sm:$0xff]  ;;  %v44_v3 = vld [vmem:[#allocation2 + $0x60] sm:$0xff]  ;;  %v91_v4 = vld [vmem:[#allocation2 + $0xf8] sm:$0xff]  ;;  %s168_s26 = sshll.u32 %s244_s25, 4  ;;  %s169_s26 = int_to_ptr.vmem [resolvable:$true] %s168_s26 }
   0x8   :  { %v43_v5 = vld [vmem:[#allocation2 + $0x58] sm:$0xff]  ;;  %97 = vmatpush.msra.mxu1 %v91_v4  ;;  %v90_v6 = vld [vmem:[#allocation2 + $0xf0] sm:$0xff]  ;;  %v89_v7 = vld [vmem:[#allocation2 + $0xe8] sm:$0xff] }
   0x9   :  { %53 = vmatpush.msra.mxu0 %v46_v1  ;;  %v42_v8 = vld [vmem:[#allocation2 + $0x50] sm:$0xff]  ;;  %v88_v9 = vld [vmem:[#allocation2 + $0xe0] sm:$0xff]  ;;  %v41_v10 = vld [vmem:[#allocation2 + $0x48] sm:$0xff] }
   0xa   :  { %98 = vmatpush.msra.mxu1 %v90_v6  ;;  %v87_v11 = vld [vmem:[#allocation2 + $0xd8] sm:$0xff]  ;;  %v40_v12 = vld [vmem:[#allocation2 + $0x40] sm:$0xff]  ;;  %v86_v13 = vld [vmem:[#allocation2 + $0xd0] sm:$0xff] }
   0xb   :  { %54 = vmatpush.msra.mxu0 %v45_v2  ;;  %v39_v14 = vld [vmem:[#allocation2 + $0x38] sm:$0xff]  ;;  %v85_v15 = vld [vmem:[#allocation2 + $0xc8] sm:$0xff]  ;;  %v38_v16 = vld [vmem:[#allocation2 + $0x30] sm:$0xff] }
   0xc   :  { %99 = vmatpush.msra.mxu1 %v89_v7  ;;  %v84_v17 = vld [vmem:[#allocation2 + $0xc0] sm:$0xff]  ;;  %v37_v18 = vld [vmem:[#allocation2 + $0x28] sm:$0xff]  ;;  %v83_v19 = vld [vmem:[#allocation2 + $0xb8] sm:$0xff] }
   0xd   :  { %55 = vmatpush.msra.mxu0 %v44_v3  ;;  %v36_v20 = vld [vmem:[#allocation2 + $0x20] sm:$0xff]  ;;  %v82_v21 = vld [vmem:[#allocation2 + $0xb0] sm:$0xff]  ;;  %v35_v22 = vld [vmem:[#allocation2 + $0x18] sm:$0xff] }
   0xe   :  { %100 = vmatpush.msra.mxu1 %v88_v9  ;;  %v81_v23 = vld [vmem:[#allocation2 + $0xa8] sm:$0xff]  ;;  %v34_v24 = vld [vmem:[#allocation2 + $0x10] sm:$0xff]  ;;  %v80_v25 = vld [vmem:[#allocation2 + $0xa0] sm:$0xff] }
   0xf   :  { %56 = vmatpush.msra.mxu0 %v43_v5  ;;  %v33_v26 = vld [vmem:[#allocation2 + $0x8] sm:$0xff]  ;;  %v79_v27 = vld [vmem:[#allocation2 + $0x98] sm:$0xff]  ;;  %v32_v28 = vld [vmem:[#allocation2] sm:$0xff] }
  0x10   :  { %101 = vmatpush.msra.mxu1 %v87_v11  ;;  %v31_v29 = vld [vmem:[%s283_s0] sm:$0xff]  ;;  %v78_v30 = vld [vmem:[#allocation2 + $0x90] sm:$0xff]  ;;  %v77_v31 = vld [vmem:[#allocation2 + $0x88] sm:$0xff] }
  0x11   :  { %57 = vmatpush.msra.mxu0 %v42_v8  ;;  %v76_v32 = vld [vmem:[#allocation2 + $0x80] sm:$0xff]  ;;  %v136_v33 = vld [vmem:[#allocation2 + $0x178] sm:$0xff]  ;;  %v135_v34 = vld [vmem:[#allocation2 + $0x170] sm:$0xff] }
  0x12   :  { %102 = vmatpush.msra.mxu1 %v86_v13  ;;  %142 = vmatpush.msra.mxu2 %v136_v33  ;;  %v134_v35 = vld [vmem:[#allocation2 + $0x168] sm:$0xff]  ;;  %v133_v36 = vld [vmem:[#allocation2 + $0x160] sm:$0xff]  ;;  %v132_v37 = vld [vmem:[#allocation2 + $0x158] sm:$0xff] }
  0x13   :  { %58 = vmatpush.msra.mxu0 %v41_v10  ;;  %v131_v38 = vld [vmem:[#allocation2 + $0x150] sm:$0xff]  ;;  %v130_v39 = vld [vmem:[#allocation2 + $0x148] sm:$0xff]  ;;  %v129_v40 = vld [vmem:[#allocation2 + $0x140] sm:$0xff] }
  0x14   :  { %103 = vmatpush.msra.mxu1 %v85_v15  ;;  %143 = vmatpush.msra.mxu2 %v135_v34  ;;  %v128_v41 = vld [vmem:[#allocation2 + $0x138] sm:$0xff]  ;;  %v127_v42 = vld [vmem:[#allocation2 + $0x130] sm:$0xff]  ;;  %v126_v43 = vld [vmem:[#allocation2 + $0x128] sm:$0xff] }
  0x15   :  { %59 = vmatpush.msra.mxu0 %v40_v12  ;;  %v125_v44 = vld [vmem:[#allocation2 + $0x120] sm:$0xff]  ;;  %v124_v45 = vld [vmem:[#allocation2 + $0x118] sm:$0xff]  ;;  %v123_v51 = vld [vmem:[#allocation2 + $0x110] sm:$0xff] }
  0x16   :  { %104 = vmatpush.msra.mxu1 %v84_v17  ;;  %144 = vmatpush.msra.mxu2 %v134_v35  ;;  %v186_v46 = vld [vmem:[%s285_s2] ss:$0 sm:$0xff]  ;;  %v122_v52 = vld [vmem:[#allocation2 + $0x108] sm:$0xff]  ;;  %v187_v54 = vld [vmem:[%s285_s2 + $0x1] ss:$0 sm:$0xff] }
  0x17   :  { %60 = vmatpush.msra.mxu0 %v39_v14  ;;  %v121_v53 = vld [vmem:[#allocation2 + $0x100] sm:$0xff] }
  0x18   :  { %105 = vmatpush.msra.mxu1 %v83_v19  ;;  %145 = vmatpush.msra.mxu2 %v133_v36  ;;  %v188_v59 = vld [vmem:[%s285_s2 + $0x2] ss:$0 sm:$0xff] }
  0x19   :  { %61 = vmatpush.msra.mxu0 %v38_v16 }
  0x1a   :  { %106 = vmatpush.msra.mxu1 %v82_v21  ;;  %146 = vmatpush.msra.mxu2 %v132_v37 }
  0x1b   :  { %62 = vmatpush.msra.mxu0 %v37_v18 }
  0x1c   :  { %107 = vmatpush.msra.mxu1 %v81_v23  ;;  %147 = vmatpush.msra.mxu2 %v131_v38 }
  0x1d   :  { %63 = vmatpush.msra.mxu0 %v36_v20 }
  0x1e   :  { %108 = vmatpush.msra.mxu1 %v80_v25  ;;  %148 = vmatpush.msra.mxu2 %v130_v39 }
  0x1f   :  { %64 = vmatpush.msra.mxu0 %v35_v22 }
  0x20   :  { %109 = vmatpush.msra.mxu1 %v79_v27  ;;  %149 = vmatpush.msra.mxu2 %v129_v40 }
  0x21   :  { %65 = vmatpush.msra.mxu0 %v34_v24 }
  0x22   :  { %110 = vmatpush.msra.mxu1 %v78_v30  ;;  %150 = vmatpush.msra.mxu2 %v128_v41 }
  0x23   :  { %66 = vmatpush.msra.mxu0 %v33_v26 }
  0x24   :  { %111 = vmatpush.msra.mxu1 %v77_v31  ;;  %151 = vmatpush.msra.mxu2 %v127_v42 }
  0x25   :  { %67 = vmatpush.msra.mxu0 %v32_v28 }
  0x26   :  { %68 = vmatmul.f32.vlgmr.msra.gmra.mxu0 %v31_v29  ;;  %112 = vmatpush.msra.mxu1 %v76_v32 }
  0x27   :  { %152 = vmatpush.msra.mxu2 %v126_v43 }
  0x29   :  { %153 = vmatpush.msra.mxu2 %v125_v44 }
  0x2b   :  { %154 = vmatpush.msra.mxu2 %v124_v45 }
  0x2d   :  { %155 = vmatpush.msra.mxu2 %v123_v51 }
  0x2f   :  { %156 = vmatpush.msra.mxu2 %v122_v52 }
  0x31   :  { %157 = vmatpush.msra.mxu2 %v121_v53 }
  0xa3   :  { %v69_v47 = vpop.f32.mrf.mxu0 }
  0xa4   :  { %v70_v48 = vadd.f32 %v186_v46, %v69_v47 }
  0xa6   :  { %vm72_vm0 = vcmp.ge.f32.partialorder %v70_v48, 0.0  ;;  %v73_v49 = vmul.f32 0.01, %v70_v48 }
  0xa8   :  { %v74_v50 = vsel %vm72_vm0, %v70_v48, %v73_v49 }
  0xa9   :  { %113 = vmatmul.f32.vlgmr.msra.gmra.mxu1 %v74_v50 }
 0x126   :  { %v114_v55 = vpop.f32.mrf.mxu1 }
 0x127   :  { %v115_v56 = vadd.f32 %v187_v54, %v114_v55 }
 0x129   :  { %vm117_vm1 = vcmp.ge.f32.partialorder %v115_v56, 0.0  ;;  %v118_v57 = vmul.f32 0.01, %v115_v56 }
 0x12b   :  { %v119_v58 = vsel %vm117_vm1, %v115_v56, %v118_v57 }
 0x12c   :  { %158 = vmatmul.f32.vlgmr.msra.gmra.mxu2 %v119_v58 }
 0x1af   :  { %v159_v60 = vpop.f32.mrf.mxu2 }
 0x1b0   :  { %v160_v61 = vadd.f32 %v188_v59, %v159_v60 }
 0x1b2   :  { %162 = vst [vmem:[#allocation5] sm:$0xff] %v160_v61 }
 0x1b3   :  { %173 = dma.vmem_to_hbm [thread:$0]  %s169_s26, 128, %s171_s29, [#allocation4]  }
 0x1b4   :  { %239 = dma.done.wait [#allocation4], 128  }
 0x1b5   :  { %240 = vsyncadd [#allocation4], 4294967168 }
 0x1b6   :  { %178 = vsyncpa [#allocation3], 1 }
 0x1b7   :  { %179 = vsyncpa [#allocation4], 1 }

</bundles_post_ra>
